<compile_context>
chip_gen: v6e
topology: v6e:2x2x1
jax: 0.10.0
libtpu: 0.0.40
codegen_flags: <defaults>
</compile_context>

<pallas_src>
import functools

import jax
import jax.numpy as jnp
from jax.experimental import pallas as pl
from jax.experimental.pallas import tpu as pltpu


def _round_up(x, m):
    return ((x + m - 1) // m) * m


def categorical_nn_kernel(x_ref, params_ref, out_ref, *,
                          n_vars, d_pad, op_pad, total_cat,
                          emb_off, w1_off, w2_off):
    """x_ref: (n_vars, tb) offset-shifted int32 indices (batch on lanes).
    params_ref: (3*d_pad, d_pad) packed f32 params. out_ref: (op_pad, tb) f32."""
    tb = x_ref.shape[1]

    # one_hot^T: categories on sublanes, batch on lanes.  Row `total_cat` is a
    # constant 1 that carries the biases through the MXU matmuls.
    iota = jax.lax.broadcasted_iota(jnp.int32, (d_pad, tb), 0)
    onehot_t = (iota == total_cat).astype(jnp.float32)
    for i in range(n_vars):                 # n_vars cheap sublane-broadcast compares
        onehot_t = onehot_t + (x_ref[i:i + 1, :] == iota).astype(jnp.float32)

    # Static, 8-row-aligned views into the resident packed parameter buffer.
    emb_t = params_ref[emb_off:emb_off + d_pad, :]   # Emb^T (block-diag) + bias carry
    w1e = params_ref[w1_off:w1_off + d_pad, :]       # [W1 | b1] + carry row
    w2e = params_ref[w2_off:w2_off + d_pad, :]       # [W2 | b2]

    # Whole forward = 3 lane-dense MXU matmuls on (feature, batch) operands.
    h_t = jnp.dot(emb_t, onehot_t, preferred_element_type=jnp.float32)   # (d_pad, tb)
    z_t = jnp.maximum(jnp.dot(w1e, h_t, preferred_element_type=jnp.float32), 0.0)
    o_t = jnp.dot(w2e, z_t, preferred_element_type=jnp.float32)
    out_ref[...] = jax.nn.sigmoid(o_t[:op_pad, :])


def categorical_nn(x, emb_tables, w1, b1, w2, b2,
                   num_categories_list, embedding_dim_list, *, tile_b=8192):
    B, n_vars = x.shape
    assert n_vars == len(num_categories_list) == len(embedding_dim_list)
    total_cat = int(sum(num_categories_list))
    total_emb = int(sum(embedding_dim_list))
    hidden = w1.shape[0]
    output_dim = w2.shape[0]

    op_pad = _round_up(output_dim, 8)
    # Shared padded feature size: must hold embedding features (+1 bias carry),
    # hidden (+1 carry), all categories (+1 ones row), and the output rows.
    d_pad = _round_up(max(total_emb + 1, hidden + 1, total_cat + 1, op_pad), 8)

    # ---- Pack all parameters into one (3*d_pad, d_pad) f32 buffer. ----
    # Emb^T: block-diagonal, features on rows / categories on cols, plus a 1 at
    # (total_emb, total_cat) so h^T carries a constant-1 feature for the biases.
    emb_t = jnp.zeros((d_pad, d_pad), jnp.float32)
    row = col = 0
    for tbl, nc, ed in zip(emb_tables, num_categories_list, embedding_dim_list):
        emb_t = emb_t.at[row:row + ed, col:col + nc].set(tbl.T.astype(jnp.float32))
        row += ed
        col += nc
    emb_t = emb_t.at[total_emb, total_cat].set(1.0)

    # W1e = [W1 | b1] with a 1 at (hidden, total_emb) to keep carrying the 1.
    w1e = jnp.zeros((d_pad, d_pad), jnp.float32)
    w1e = w1e.at[:hidden, :total_emb].set(w1.astype(jnp.float32))
    w1e = w1e.at[:hidden, total_emb].set(b1.reshape(-1).astype(jnp.float32))
    w1e = w1e.at[hidden, total_emb].set(1.0)

    # W2e = [W2 | b2].
    w2e = jnp.zeros((d_pad, d_pad), jnp.float32)
    w2e = w2e.at[:output_dim, :hidden].set(w2.astype(jnp.float32))
    w2e = w2e.at[:output_dim, hidden].set(b2.reshape(-1).astype(jnp.float32))

    params = jnp.concatenate([emb_t, w1e, w2e], axis=0)      # one params DMA
    emb_off, w1_off, w2_off = 0, d_pad, 2 * d_pad

    # ---- Batch tiling: batch on the lane axis; >=2 grid steps when large so
    # both v7x TensorCores are used; tile derived from step count to avoid
    # gross over-padding. ----
    b_lane = _round_up(B, 128)
    n_steps = max(pl.cdiv(b_lane, tile_b), 2 if b_lane >= 256 else 1)
    tb = _round_up(pl.cdiv(b_lane, n_steps), 128)
    b_pad = n_steps * tb

    # Offset-shift indices so a single one-hot addresses the block-diag table.
    offs, off = [], 0
    for nc in num_categories_list:
        offs.append(off)
        off += nc
    x_i32 = x.astype(jnp.int32)
    if b_pad != B:
        x_i32 = jnp.pad(x_i32, ((0, b_pad - B), (0, 0)))     # padded rows: category 0
    x_t = (x_i32 + jnp.asarray(offs, jnp.int32)[None, :]).T  # (n_vars, b_pad)

    kernel = functools.partial(
        categorical_nn_kernel,
        n_vars=n_vars, d_pad=d_pad, op_pad=op_pad, total_cat=total_cat,
        emb_off=emb_off, w1_off=w1_off, w2_off=w2_off)

    cost = pl.CostEstimate(
        flops=2 * B * (total_cat * total_emb + total_emb * hidden
                       + hidden * output_dim),
        transcendentals=B * output_dim,
        bytes_accessed=(B * n_vars * 4 + B * output_dim * 4
                        + int(params.size) * 4),
    )

    out_t = pl.pallas_call(
        kernel,
        out_shape=jax.ShapeDtypeStruct((op_pad, b_pad), jnp.float32),
        grid_spec=pltpu.PrefetchScalarGridSpec(
            num_scalar_prefetch=0,
            grid=(n_steps,),
            in_specs=[
                pl.BlockSpec((n_vars, tb), lambda i: (0, i)),        # batch tile
                pl.BlockSpec((3 * d_pad, d_pad), lambda i: (0, 0)),  # resident params
            ],
            out_specs=pl.BlockSpec((op_pad, tb), lambda i: (0, i)),
        ),
        compiler_params=pltpu.CompilerParams(
            dimension_semantics=("parallel",)),
        cost_estimate=cost,
    )(x_t, params)

    return out_t[:output_dim, :B].T


def categorical_nn_ref(x, emb_tables, w1, b1, w2, b2):
    """Pure-JAX reference matching the PyTorch forward."""
    embedded = [emb_tables[i][x[:, i]] for i in range(len(emb_tables))]
    h = jnp.concatenate(embedded, axis=1)
    h = jnp.maximum(h @ w1.T + b1, 0.0)
    return jax.nn.sigmoid(h @ w2.T + b2)


if __name__ == "__main__":
    num_categories_list = [6, 5, 9]
    embedding_dim_list = [8, 8, 16]
    hidden_dim = 32
    output_dim = 16
    B = 8

    key = jax.random.PRNGKey(0)
    keys = jax.random.split(key, 10)

    # nn.Embedding init: N(0, 1)
    emb_tables = [
        jax.random.normal(keys[i], (c, e), jnp.float32)
        for i, (c, e) in enumerate(zip(num_categories_list, embedding_dim_list))
    ]

    total_embedding_dim = sum(embedding_dim_list)

    # nn.Linear init: U(-1/sqrt(fan_in), 1/sqrt(fan_in)) for weight and bias
    bound1 = 1.0 / (total_embedding_dim ** 0.5)
    w1 = jax.random.uniform(keys[3], (hidden_dim, total_embedding_dim),
                            jnp.float32, -bound1, bound1)
    b1 = jax.random.uniform(keys[4], (1, hidden_dim), jnp.float32, -bound1, bound1)

    bound2 = 1.0 / (hidden_dim ** 0.5)
    w2 = jax.random.uniform(keys[5], (output_dim, hidden_dim),
                            jnp.float32, -bound2, bound2)
    b2 = jax.random.uniform(keys[6], (1, output_dim), jnp.float32, -bound2, bound2)

    # Categorical input indices (B, n_vars)
    x = jnp.stack(
        [jax.random.randint(keys[7 + i], (B,), 0, num_categories_list[i])
         for i in range(len(num_categories_list))],
        axis=1,
    ).astype(jnp.int32)

    out = categorical_nn(x, emb_tables, w1, b1, w2, b2,
                         num_categories_list, embedding_dim_list)
    out = jax.block_until_ready(out)

    ref = categorical_nn_ref(x, emb_tables, w1, b1, w2, b2)
    assert out.shape == (B, output_dim)
    assert jnp.allclose(out, ref, atol=1e-5, rtol=1e-5)

    print("KERNEL_OK")
</pallas_src>

<mosaic_0001>
module attributes {stable_mosaic.version = 11 : i64} {
  func.func @categorical_nn_kernel(%arg0: i32, %arg1: memref<3x128xi32, #tpu.memory_space<vmem>>, %arg2: memref<120x40xf32, #tpu.memory_space<vmem>>, %arg3: memref<16x128xf32, #tpu.memory_space<vmem>>) attributes {dimension_semantics = [#tpu.dimension_semantics<parallel>], iteration_bounds = array<i64: 1>, scalar_prefetch = 0 : i64, scratch_operands = 0 : i64, tpu.core_type = #tpu.core_type<tc>, window_params = [{transform_indices = @transform_0, window_bounds = array<i64: 3, 128>}, {pipeline_mode = #tpu.pipeline_mode<synchronous>, transform_indices = @transform_1, window_bounds = array<i64: 120, 40>}, {transform_indices = @transform_2, window_bounds = array<i64: 16, 128>}]} {
    %0 = tpu.iota {dimensions = array<i32: 0>} : vector<40x128xi32>
    %c20_i32 = arith.constant 20 : i32
    %1 = vector.broadcast %c20_i32 : i32 to vector<40x128xi32>
    %2 = arith.cmpi eq, %0, %1 : vector<40x128xi32>
    %3 = arith.extui %2 : vector<40x128xi1> to vector<40x128xi32>
    %4 = arith.sitofp %3 : vector<40x128xi32> to vector<40x128xf32>
    %c0 = arith.constant 0 : index
    %c0_0 = arith.constant 0 : index
    %5 = vector.load %arg1[%c0, %c0_0] : memref<3x128xi32, #tpu.memory_space<vmem>>, vector<1x128xi32>
    %6 = vector.broadcast %5 : vector<1x128xi32> to vector<40x128xi32>
    %7 = arith.cmpi eq, %6, %0 : vector<40x128xi32>
    %8 = arith.extui %7 : vector<40x128xi1> to vector<40x128xi32>
    %9 = arith.sitofp %8 : vector<40x128xi32> to vector<40x128xf32>
    %10 = arith.addf %4, %9 : vector<40x128xf32>
    %c1 = arith.constant 1 : index
    %c0_1 = arith.constant 0 : index
    %11 = vector.load %arg1[%c1, %c0_1] : memref<3x128xi32, #tpu.memory_space<vmem>>, vector<1x128xi32>
    %12 = vector.broadcast %11 : vector<1x128xi32> to vector<40x128xi32>
    %13 = arith.cmpi eq, %12, %0 : vector<40x128xi32>
    %14 = arith.extui %13 : vector<40x128xi1> to vector<40x128xi32>
    %15 = arith.sitofp %14 : vector<40x128xi32> to vector<40x128xf32>
    %16 = arith.addf %10, %15 : vector<40x128xf32>
    %c2 = arith.constant 2 : index
    %c0_2 = arith.constant 0 : index
    %17 = vector.load %arg1[%c2, %c0_2] : memref<3x128xi32, #tpu.memory_space<vmem>>, vector<1x128xi32>
    %18 = vector.broadcast %17 : vector<1x128xi32> to vector<40x128xi32>
    %19 = arith.cmpi eq, %18, %0 : vector<40x128xi32>
    %20 = arith.extui %19 : vector<40x128xi1> to vector<40x128xi32>
    %21 = arith.sitofp %20 : vector<40x128xi32> to vector<40x128xf32>
    %22 = arith.addf %16, %21 : vector<40x128xf32>
    %c0_3 = arith.constant 0 : index
    %c0_4 = arith.constant 0 : index
    %23 = vector.load %arg2[%c0_3, %c0_4] : memref<120x40xf32, #tpu.memory_space<vmem>>, vector<40x40xf32>
    %c40 = arith.constant 40 : index
    %c0_5 = arith.constant 0 : index
    %24 = vector.load %arg2[%c40, %c0_5] : memref<120x40xf32, #tpu.memory_space<vmem>>, vector<40x40xf32>
    %c80 = arith.constant 80 : index
    %c0_6 = arith.constant 0 : index
    %25 = vector.load %arg2[%c80, %c0_6] : memref<120x40xf32, #tpu.memory_space<vmem>>, vector<40x40xf32>
    %cst = arith.constant dense<0.000000e+00> : vector<40x128xf32>
    %26 = tpu.matmul %23, %22, %cst {dimension_numbers = #tpu.dot_dimension_numbers<[1], [0], [0], [1], [0, 0, 1, 1], [], []>} : vector<40x40xf32>, vector<40x128xf32>, vector<40x128xf32> -> vector<40x128xf32>
    %cst_7 = arith.constant dense<0.000000e+00> : vector<40x128xf32>
    %27 = tpu.matmul %24, %26, %cst_7 {dimension_numbers = #tpu.dot_dimension_numbers<[1], [0], [0], [1], [0, 0, 1, 1], [], []>} : vector<40x40xf32>, vector<40x128xf32>, vector<40x128xf32> -> vector<40x128xf32>
    %cst_8 = arith.constant 0.000000e+00 : f32
    %28 = vector.broadcast %cst_8 : f32 to vector<40x128xf32>
    %29 = arith.maximumf %27, %28 : vector<40x128xf32>
    %cst_9 = arith.constant dense<0.000000e+00> : vector<40x128xf32>
    %30 = tpu.matmul %25, %29, %cst_9 {dimension_numbers = #tpu.dot_dimension_numbers<[1], [0], [0], [1], [0, 0, 1, 1], [], []>} : vector<40x40xf32>, vector<40x128xf32>, vector<40x128xf32> -> vector<40x128xf32>
    %31 = vector.extract_strided_slice %30 {offsets = [0, 0], sizes = [16, 128], strides = [1, 1]} : vector<40x128xf32> to vector<16x128xf32>
    %32 = arith.negf %31 : vector<16x128xf32>
    %33 = math.exp %32 : vector<16x128xf32>
    %cst_10 = arith.constant 1.000000e+00 : f32
    %34 = vector.broadcast %cst_10 : f32 to vector<16x128xf32>
    %35 = arith.addf %34, %33 : vector<16x128xf32>
    %36 = arith.divf %34, %35 : vector<16x128xf32>
    %c0_11 = arith.constant 0 : index
    %c0_12 = arith.constant 0 : index
    %37 = vector.load %arg3[%c0_11, %c0_12] : memref<16x128xf32, #tpu.memory_space<vmem>>, vector<16x128xf32>
    tpu.vector_store %arg3[%c0_11, %c0_12], %36 {strides = array<i32>} : memref<16x128xf32, #tpu.memory_space<vmem>>, vector<16x128xf32>,
    return
  }
  func.func @transform_0(%arg0: i32) -> (i32, i32) {
    %c0_i32 = arith.constant 0 : i32
    %c0_i32_0 = arith.constant 0 : i32
    return %c0_i32, %arg0 : i32, i32
  }
  func.func @transform_1(%arg0: i32) -> (i32, i32) {
    %c0_i32 = arith.constant 0 : i32
    %c0_i32_0 = arith.constant 0 : i32
    %c0_i32_1 = arith.constant 0 : i32
    return %c0_i32, %c0_i32_0 : i32, i32
  }
  func.func @transform_2(%arg0: i32) -> (i32, i32) {
    %c0_i32 = arith.constant 0 : i32
    %c0_i32_0 = arith.constant 0 : i32
    return %c0_i32, %arg0 : i32, i32
  }
}

</mosaic_0001>

<bundles_post_ra>
// kernel: tpu_custom_call.1
= control target key start
LH: loop header
LB: loop body
LE: loop exit
PB: predicated region body
PF: predicated region fallthrough
CT: control target
= control target key end

     0   :  { %v12_v0 = vlaneseq  ;;  %v657_v1 = vmov 0.0   ;;  %vm658_vm0 = vmmov 0   ;;  %s818_s0 = inlined_call_operand.vmem [shape: s32[3,128], index: 0, kind: input, shape index: {}]   ;;  %s819_s1 = inlined_call_operand.vmem [shape: f32[120,40], index: 1, kind: input, shape index: {}]   ;;  %s820_s2 = inlined_call_operand.hbm [shape: f32[16,128], index: 2, kind: output, shape index: {}]  }
   0x1   :  { %537 = vmatprep.subr.mxu0 %v657_v1  ;;  %612 = vmatprep.subr.mxu1 %v657_v1  ;;  %v472_v3 = vld [vmem:[%s818_s0] ss:$0 sm:$0xff]  ;;  %v478_v4 = vld [vmem:[%s818_s0 + $0x1] ss:$0 sm:$0xff]  ;;  %v484_v5 = vld [vmem:[%s818_s0 + $0x2] ss:$0 sm:$0xff] }
   0x2   :  { %v13_v2 = vshrl.u32 %v12_v0, 7  ;;  %547 = vmatprep.mubr.msk.f32.mxu0 %vm658_vm0, %v657_v1  ;;  %556 = vmatprep.mubr.msk.f32.mxu1 %vm658_vm0, %v657_v1 }
   0x3   :  { %7 = vsyncpa [#allocation3], 0  ;;  %v108_v37 = vld [vmem:[%s819_s1] sm:$0xff]  ;;  %v111_v38 = vld [vmem:[%s819_s1 + $0x18] sm:$0xff] }
   0x4   :  { %v17_v6 = vadd.s32 32, %v13_v2  ;;  %v16_v7 = vadd.s32 24, %v13_v2  ;;  %v15_v8 = vadd.s32 16, %v13_v2  ;;  %v14_v9 = vadd.s32 8, %v13_v2  ;;  %v109_v39 = vld [vmem:[%s819_s1 + $0x8] sm:$0xff]  ;;  %v112_v40 = vld [vmem:[%s819_s1 + $0x20] sm:$0xff] }
   0x5   :  { %vm38_vm1 = vcmp.eq.s32.totalorder %v472_v3, %v13_v2  ;;  %vm63_vm2 = vcmp.eq.s32.totalorder %v478_v4, %v13_v2  ;;  %vm88_vm3 = vcmp.eq.s32.totalorder %v484_v5, %v13_v2  ;;  %v110_v41 = vld [vmem:[%s819_s1 + $0x10] sm:$0xff]  ;;  %v113_v52 = vld [vmem:[%s819_s1 + $0x28] sm:$0xff]  ;;  %v115_v54 = vld [vmem:[%s819_s1 + $0x38] sm:$0xff] }
   0x6   :  { %vm42_vm4 = vcmp.eq.s32.totalorder %v472_v3, %v17_v6  ;;  %vm67_vm5 = vcmp.eq.s32.totalorder %v478_v4, %v17_v6  ;;  %vm92_vm6 = vcmp.eq.s32.totalorder %v484_v5, %v17_v6  ;;  %vm41_vm7 = vcmp.eq.s32.totalorder %v472_v3, %v16_v7  ;;  %v114_v53 = vld [vmem:[%s819_s1 + $0x30] sm:$0xff]  ;;  %v116_v55 = vld [vmem:[%s819_s1 + $0x40] sm:$0xff]  ;;  %v117_v56 = vld [vmem:[%s819_s1 + $0x48] sm:$0xff] }
   0x7   :  { %v477_v10 = vsel %vm42_vm4, 1.0, %v657_v1  ;;  %v483_v11 = vsel %vm67_vm5, 1.0, %v657_v1  ;;  %v489_v12 = vsel %vm92_vm6, 1.0, %v657_v1  ;;  %v476_v13 = vsel %vm41_vm7, 1.0, %v657_v1 }
   0x8   :  { %v82_v14 = vadd.f32 %v483_v11, %v477_v10  ;;  %vm66_vm8 = vcmp.eq.s32.totalorder %v478_v4, %v16_v7  ;;  %vm91_vm9 = vcmp.eq.s32.totalorder %v484_v5, %v16_v7  ;;  %vm20_vm10 = vcmp.eq.s32.totalorder %v15_v8, 20  ;;  %v119_v10 = vld [vmem:[%s819_s1 + $0x58] sm:$0xff]  ;;  %v120_v11 = vld [vmem:[%s819_s1 + $0x60] sm:$0xff] }
   0x9   :  { %v482_v15 = vsel %vm66_vm8, 1.0, %v657_v1  ;;  %v488_v16 = vsel %vm91_vm9, 1.0, %v657_v1  ;;  %v471_v17 = vsel %vm20_vm10, 1.0, %v657_v1  ;;  %vm40_vm11 = vcmp.eq.s32.totalorder %v472_v3, %v15_v8 }
   0xa   :  { %v107_v18 = vadd.f32 %v489_v12, %v82_v14  ;;  %v81_v19 = vadd.f32 %v482_v15, %v476_v13  ;;  %v475_v20 = vsel %vm40_vm11, 1.0, %v657_v1  ;;  %vm65_vm12 = vcmp.eq.s32.totalorder %v478_v4, %v15_v8  ;;  %v121_v12 = vld [vmem:[%s819_s1 + $0x68] sm:$0xff]  ;;  %v122_v13 = vld [vmem:[%s819_s1 + $0x70] sm:$0xff] }
   0xb   :  { %v55_v21 = vadd.f32 %v475_v20, %v471_v17  ;;  %v481_v22 = vsel %vm65_vm12, 1.0, %v657_v1  ;;  %vm90_vm13 = vcmp.eq.s32.totalorder %v484_v5, %v15_v8  ;;  %vm39_vm14 = vcmp.eq.s32.totalorder %v472_v3, %v14_v9 }
   0xc   :  { %538 = vmatpush3.msra.mxu0 %v107_v18  ;;  %617 = vmatpush3.msra.mxu1 %v107_v18  ;;  %v106_v23 = vadd.f32 %v488_v16, %v81_v19  ;;  %v487_v24 = vsel %vm90_vm13, 1.0, %v657_v1  ;;  %v474_v25 = vsel %vm39_vm14, 1.0, %v657_v1  ;;  %vm64_vm15 = vcmp.eq.s32.totalorder %v478_v4, %v14_v9 }
   0xd   :  { %539 = vmatprep.subr.mxu0 %v657_v1  ;;  %613 = vmatprep.subr.mxu1 %v657_v1  ;;  %v80_v26 = vadd.f32 %v481_v22, %v55_v21  ;;  %v480_v27 = vsel %vm64_vm15, 1.0, %v657_v1  ;;  %vm89_vm4 = vcmp.eq.s32.totalorder %v484_v5, %v14_v9  ;;  %v473_v28 = vsel %vm38_vm1, 1.0, %v657_v1  ;;  %v118_v9 = vld [vmem:[%s819_s1 + $0x50] sm:$0xff]  ;;  %s659_s1 = smov [#allocation2]  }
   0xe   :  { %540 = vmatpush3.msra.mxu0 %v106_v23  ;;  %618 = vmatpush3.msra.mxu1 %v106_v23  ;;  %v79_v29 = vadd.f32 %v480_v27, %v474_v25  ;;  %v486_v30 = vsel %vm89_vm4, 1.0, %v657_v1  ;;  %v479_v31 = vsel %vm63_vm2, 1.0, %v657_v1  ;;  %v485_v32 = vsel %vm88_vm3, 1.0, %v657_v1  ;;  %s460_s15 = sshll.u32 %s659_s1, 4  ;;  %s461_s15 = int_to_ptr.vmem [resolvable:$true] %s460_s15 }
   0xf   :  { %541 = vmatprep.subr.mxu0 %v657_v1  ;;  %614 = vmatprep.subr.mxu1 %v657_v1  ;;  %v105_v33 = vadd.f32 %v487_v24, %v80_v26  ;;  %v78_v34 = vadd.f32 %v479_v31, %v473_v28  ;;  %vm123_vm1 = vcmask 326656   ;;  %s635_s16 = scalar_lea.vmem %s461_s15, 256  ;;  %p640_p1 = scmp.lt.s32.totalorder %s461_s15, %s461_s15 }
  0x10   :  { %v104_v35 = vadd.f32 %v486_v30, %v79_v29  ;;  %p636_p0 = scmp.ne.s32.totalorder %s461_s15, %s635_s16  ;;  %p641_p2 = scmp.lt.s32.totalorder %s635_s16, %s635_s16 }
  0x11   :  { %542 = vmatpush3.msra.mxu0 %v105_v33  ;;  %619 = vmatpush3.msra.mxu1 %v105_v33  ;;  %v103_v36 = vadd.f32 %v485_v32, %v78_v34 }
  0x12   :  { %543 = vmatprep.subr.mxu0 %v657_v1  ;;  %615 = vmatprep.subr.mxu1 %v657_v1  ;;  %p642_p3 = por %p641_p2, %p640_p1 }
  0x13   :  { %544 = vmatpush3.msra.mxu0 %v104_v35  ;;  %620 = vmatpush3.msra.mxu1 %v104_v35 }
  0x14   :  { %545 = vmatprep.subr.mxu0 %v657_v1  ;;  %616 = vmatprep.subr.mxu1 %v657_v1  ;;  %p643_p4 = pnand %p642_p3, %p636_p0 }
  0x15   :  { %546 = vmatpush3.msra.mxu0 %v103_v36  ;;  %621 = vmatpush3.msra.mxu1 %v103_v36 }
  0x16   :  { %548 = vmatmul.mubr.msk.f32.vlgmr.msra.gmra.mxu0 %vm123_vm1, %v108_v37  ;;  %557 = vmatmul.mubr.msk.f32.vlgmr.msra.gmra.mxu1 %vm123_vm1, %v111_v38 }
  0x17   :  { %550 = vmatprep.mubr.msk.f32.mxu0 %vm658_vm0, %v657_v1  ;;  %559 = vmatprep.mubr.msk.f32.mxu1 %vm658_vm0, %v657_v1 }
  0x18   :  { %562 = vmatprep.subr.mxu1 %v657_v1  ;;  %587 = vmatprep.subr.mxu0 %v657_v1 }
  0x1a   :  { %551 = vmatmul.mubr.msk.f32.gmra.mxu0 %vm123_vm1, %v109_v39  ;;  %560 = vmatmul.mubr.msk.f32.gmra.mxu1 %vm123_vm1, %v112_v40 }
  0x1b   :  { %553 = vmatprep.mubr.msk.f32.mxu0 %vm658_vm0, %v657_v1  ;;  %572 = vmatprep.mubr.msk.f32.mxu1 %vm658_vm0, %v657_v1 }
  0x1e   :  { %554 = vmatmul.mubr.msk.f32.gmra.mxu0 %vm123_vm1, %v110_v41 }
  0x1f   :  { %597 = vmatprep.mubr.msk.f32.mxu0 %vm658_vm0, %v657_v1 }
  0xd6   :  { %v205_v42 = vpop.f32.mrf.mxu0  ;;  %v220_v43 = vpop.f32.mrf.mxu1 }
  0xd8   :  { %v549_v44 = vpop.f32.mrf.mxu0  ;;  %v558_v45 = vpop.f32.mrf.mxu1 }
  0xda   :  { %v210_v46 = vpop.f32.mrf.mxu0  ;;  %v225_v47 = vpop.f32.mrf.mxu1 }
  0xdb   :  { %563 = vmatpush3.msra.mxu1 %v225_v47 }
  0xdc   :  { %v552_v48 = vpop.f32.mrf.mxu0  ;;  %v561_v49 = vpop.f32.mrf.mxu1  ;;  %564 = vmatprep.subr.mxu1 %v657_v1 }
  0xdd   :  { %565 = vmatpush3.msra.mxu1 %v220_v43 }
  0xde   :  { %v215_v50 = vpop.f32.mrf.mxu0  ;;  %566 = vmatprep.subr.mxu1 %v657_v1 }
  0xdf   :  { %567 = vmatpush3.msra.mxu1 %v215_v50 }
  0xe0   :  { %v555_v51 = vpop.f32.mrf.mxu0  ;;  %568 = vmatprep.subr.mxu1 %v657_v1 }
  0xe1   :  { %569 = vmatpush3.msra.mxu1 %v210_v46 }
  0xe2   :  { %570 = vmatprep.subr.mxu1 %v657_v1 }
  0xe3   :  { %571 = vmatpush3.msra.mxu1 %v205_v42 }
  0xe4   :  { %573 = vmatmul.mubr.msk.f32.vlgmr.msra.gmra.mxu1 %vm123_vm1, %v113_v52 }
  0xe5   :  { %575 = vmatprep.mubr.msk.f32.mxu1 %vm658_vm0, %v657_v1 }
  0xe8   :  { %576 = vmatmul.mubr.msk.f32.gmra.mxu1 %vm123_vm1, %v114_v53 }
  0xe9   :  { %578 = vmatprep.mubr.msk.f32.mxu1 %vm658_vm0, %v657_v1 }
  0xec   :  { %579 = vmatmul.mubr.msk.f32.gmra.mxu1 %vm123_vm1, %v115_v54 }
  0xed   :  { %581 = vmatprep.mubr.msk.f32.mxu1 %vm658_vm0, %v657_v1 }
  0xf0   :  { %582 = vmatmul.mubr.msk.f32.gmra.mxu1 %vm123_vm1, %v116_v55 }
  0xf1   :  { %584 = vmatprep.mubr.msk.f32.mxu1 %vm658_vm0, %v657_v1 }
  0xf4   :  { %585 = vmatmul.mubr.msk.f32.gmra.mxu1 %vm123_vm1, %v117_v56 }
 0x1a4   :  { %v310_v57 = vpop.f32.mrf.mxu1 }
 0x1a5   :  { %v334_v8 = vmax.f32 %v310_v57, 0.0 }
 0x1a6   :  { %v574_v58 = vpop.f32.mrf.mxu1 }
 0x1a8   :  { %v315_v59 = vpop.f32.mrf.mxu1 }
 0x1a9   :  { %v335_v7 = vmax.f32 %v315_v59, 0.0 }
 0x1aa   :  { %v577_v60 = vpop.f32.mrf.mxu1 }
 0x1ac   :  { %v320_v61 = vpop.f32.mrf.mxu1 }
 0x1ad   :  { %v336_v6 = vmax.f32 %v320_v61, 0.0 }
 0x1ae   :  { %v580_v62 = vpop.f32.mrf.mxu1 }
 0x1b0   :  { %v325_v63 = vpop.f32.mrf.mxu1 }
 0x1b1   :  { %v337_v5 = vmax.f32 %v325_v63, 0.0 }
 0x1b2   :  { %v583_v0 = vpop.f32.mrf.mxu1 }
 0x1b4   :  { %v330_v2 = vpop.f32.mrf.mxu1 }
 0x1b5   :  { %v338_v3 = vmax.f32 %v330_v2, 0.0 }
 0x1b6   :  { %v586_v4 = vpop.f32.mrf.mxu1 }
 0x1b7   :  { %588 = vmatpush3.msra.mxu0 %v338_v3 }
 0x1b8   :  { %589 = vmatprep.subr.mxu0 %v657_v1 }
 0x1b9   :  { %590 = vmatpush3.msra.mxu0 %v337_v5 }
 0x1ba   :  { %591 = vmatprep.subr.mxu0 %v657_v1 }
 0x1bb   :  { %592 = vmatpush3.msra.mxu0 %v336_v6 }
 0x1bc   :  { %593 = vmatprep.subr.mxu0 %v657_v1 }
 0x1bd   :  { %594 = vmatpush3.msra.mxu0 %v335_v7 }
 0x1be   :  { %595 = vmatprep.subr.mxu0 %v657_v1 }
 0x1bf   :  { %596 = vmatpush3.msra.mxu0 %v334_v8 }
 0x1c0   :  { %598 = vmatmul.mubr.msk.f32.vlgmr.msra.gmra.mxu0 %vm123_vm1, %v118_v9 }
 0x1c1   :  { %600 = vmatprep.mubr.msk.f32.mxu0 %vm658_vm0, %v657_v1 }
 0x1c4   :  { %601 = vmatmul.mubr.msk.f32.gmra.mxu0 %vm123_vm1, %v119_v10 }
 0x1c5   :  { %603 = vmatprep.mubr.msk.f32.mxu0 %vm658_vm0, %v657_v1 }
 0x1c8   :  { %604 = vmatmul.mubr.msk.f32.gmra.mxu0 %vm123_vm1, %v120_v11 }
 0x1c9   :  { %606 = vmatprep.mubr.msk.f32.mxu0 %vm658_vm0, %v657_v1 }
 0x1cc   :  { %607 = vmatmul.mubr.msk.f32.gmra.mxu0 %vm123_vm1, %v121_v12 }
 0x1cd   :  { %609 = vmatprep.mubr.msk.f32.mxu0 %vm658_vm0, %v657_v1 }
 0x1d0   :  { %610 = vmatmul.mubr.msk.f32.gmra.mxu0 %vm123_vm1, %v122_v13 }
 0x280   :  { %v420_v14 = vpop.f32.mrf.mxu0 }
 0x281   :  { %v505_v15 = vmul.f32 -1.442695, %v420_v14 }
 0x282   :  { %v599_v16 = vpop.f32.mrf.mxu0 }
 0x283   :  { %627 = vpow2.f32 %v505_v15 }
 0x284   :  { %v425_v17 = vpop.f32.mrf.mxu0 }
 0x285   :  { %v506_v18 = vmul.f32 -1.442695, %v425_v17 }
 0x286   :  { %v602_v19 = vpop.f32.mrf.mxu0 }
 0x287   :  { %629 = vpow2.f32 %v506_v18 }
 0x288   :  { %v430_v20 = vpop.f32.mrf.mxu0 }
 0x28a   :  { %v605_v21 = vpop.f32.mrf.mxu0 }
 0x28c   :  { %v434_v22 = vpop.f32.mrf.mxu0 }
 0x28e   :  { %v608_v23 = vpop.f32.mrf.mxu0 }
 0x290   :  { %v628_v24 = vpop.eup %627  ;;  %v438_v1 = vpop.f32.mrf.mxu0 }
 0x291   :  { %v447_v25 = vadd.f32 1.0, %v628_v24 }
 0x292   :  { %v611_v26 = vpop.f32.mrf.mxu0 }
 0x293   :  { %631 = vrcp.f32 %v447_v25 }
 0x294   :  { %v630_v27 = vpop.eup %629 }
 0x295   :  { %v448_v28 = vadd.f32 1.0, %v630_v27 }
 0x297   :  { %633 = vrcp.f32 %v448_v28 }
 0x2a0   :  { %v632_v29 = vpop.eup %631 }
 0x2a1   :  { %453 = vst [vmem:[#allocation2] sm:$0xff] %v632_v29 }
 0x2a4   :  { %v634_v30 = vpop.eup %633 }
 0x2a5   :  { %454 = vst [vmem:[#allocation2 + $0x8] sm:$0xff] %v634_v30 }
 0x2a6   :  { %646 = shalt.err (!%p643_p4)
}
 0x2a7   :  { %s660_s17 = smov 128   ;;  %s661_s18 = smov 8  }
 0x2a8   :  { %466 = dma.vmem_to_hbm [thread:$0]  %s461_s15, 256, %s820_s2, [#allocation3], %s660_s17, %s660_s17, %s661_s18  }
 0x2a9   :  { %655 = dma.done.wait [#allocation3], 256  }
 0x2aa   :  { %656 = vsyncadd [#allocation3], 4294967040 }
 0x2ab   :  { %470 = vsyncpa [#allocation3], 1 }

</bundles_post_ra>
